<compile_context>
chip_gen: v7x
topology: tpu7x:2x2x1
jax: 0.10.0
libtpu: 0.0.40
codegen_flags: <defaults>
</compile_context>

<pallas_src>
import functools

import jax
import jax.numpy as jnp
from jax.experimental import pallas as pl
from jax.experimental.pallas import tpu as pltpu

_SQRT_2_OVER_PI = 0.7978845608028654  # sqrt(2/pi)


def _round_up(v, m):
    return ((v + m - 1) // m) * m


# ---------------------------------------------------------------------------
# Fused kernel: logits = GELU(x @ W_enc + b_enc) @ W_head + b_head
# Single step, everything resident in VMEM; features never round-trip to HBM
# unless explicitly requested.
# ---------------------------------------------------------------------------
def _encode_and_head(x_ref, ew_ref, eb_ref, hw_ref, hb_ref):
    # encoder matmul: bf16 MXU operands, f32 accumulation
    h = jnp.dot(x_ref[...], ew_ref[...], preferred_element_type=jnp.float32)
    h = h + eb_ref[...]
    # tanh-approx GELU in f32 (VPU + EUP; no bf16 elementwise -> v5e safe)
    h = 0.5 * h * (1.0 + jnp.tanh(_SQRT_2_OVER_PI * (h + 0.044715 * h * h * h)))
    # head matmul on VMEM-resident features (lane-dense 128-wide contraction)
    logits = jnp.dot(h.astype(hw_ref.dtype), hw_ref[...],
                     preferred_element_type=jnp.float32)
    return h, logits + hb_ref[...]


def _fused_kernel_logits(x_ref, ew_ref, eb_ref, hw_ref, hb_ref, logits_ref):
    _, logits = _encode_and_head(x_ref, ew_ref, eb_ref, hw_ref, hb_ref)
    logits_ref[...] = logits.astype(logits_ref.dtype)


def _fused_kernel_feats(x_ref, ew_ref, eb_ref, hw_ref, hb_ref,
                        logits_ref, feat_ref):
    h, logits = _encode_and_head(x_ref, ew_ref, eb_ref, hw_ref, hb_ref)
    feat_ref[...] = h.astype(feat_ref.dtype)          # lane-dense (Ep=128k) store
    logits_ref[...] = logits.astype(logits_ref.dtype)


def fused_encoder_head(x, enc_w, enc_b, head_w, head_b, *, return_feature):
    """x:(Bp,Kp) bf16, enc_w:(Kp,Ep) bf16, enc_b:(1,Ep) f32,
    head_w:(Ep,Np) bf16, head_b:(1,Np) f32.
    Returns padded logits (Bp,Np) f32, and padded feats (Bp,Ep) f32 if asked."""
    Bp, _ = x.shape
    Ep = enc_w.shape[1]
    Np = head_w.shape[1]
    vmem = pl.BlockSpec(memory_space=pltpu.MemorySpace.VMEM)
    if return_feature:
        return pl.pallas_call(
            _fused_kernel_feats,
            out_shape=(
                jax.ShapeDtypeStruct((Bp, Np), jnp.float32),  # lane-dense logits
                jax.ShapeDtypeStruct((Bp, Ep), jnp.float32),  # lane-dense feats
            ),
            in_specs=[vmem, vmem, vmem, vmem, vmem],
            out_specs=(vmem, vmem),
        )(x, enc_w, enc_b, head_w, head_b)
    return pl.pallas_call(
        _fused_kernel_logits,
        out_shape=jax.ShapeDtypeStruct((Bp, Np), jnp.float32),
        in_specs=[vmem, vmem, vmem, vmem, vmem],
        out_specs=vmem,
    )(x, enc_w, enc_b, head_w, head_b)


# ---------------------------------------------------------------------------
# jit-fused forward: flatten / pads / casts / slices fuse with the pallas_call.
# ---------------------------------------------------------------------------
def _forward(image, enc_w, enc_b, head_w, head_b, *,
             kdim, kdim_pad, embed_dim, n_class, return_feature):
    B = image.shape[0]
    x = image.reshape(B, -1).astype(jnp.bfloat16)               # NCHW flatten
    x = jnp.pad(x, ((0, 0), (0, kdim_pad - kdim)))              # K -> mult of 128
    Bp = _round_up(B, 16)                                       # bf16 vreg = [16,128]
    x = jnp.pad(x, ((0, Bp - B), (0, 0)))

    if return_feature:
        logits_p, feats_p = fused_encoder_head(
            x, enc_w, enc_b, head_w, head_b, return_feature=True)
        return logits_p[:B, :n_class], feats_p[:B, :embed_dim]

    logits_p = fused_encoder_head(
        x, enc_w, enc_b, head_w, head_b, return_feature=False)
    return logits_p[:B, :n_class]


class CustomModelPallas:
    """JAX/Pallas equivalent of CustomModel(encoder, head)."""

    def __init__(self, key, in_ch, h, w, embed_dim, n_class):
        kdim = in_ch * h * w
        self.kdim = kdim
        self.embed_dim = embed_dim
        self.n_class = n_class
        self.kdim_pad = _round_up(kdim, 128)      # lane-aligned reduction dim
        self.e_pad = _round_up(embed_dim, 128)    # lane-dense features / head-K
        self.n_pad = _round_up(n_class, 128)      # lane-dense logits

        k1, k2, k3, k4 = jax.random.split(key, 4)
        # deterministic synthetic params (uniform, torch-Linear-style scale)
        s_enc = 1.0 / jnp.sqrt(kdim)
        s_head = 1.0 / jnp.sqrt(embed_dim)
        enc_w = jax.random.uniform(k1, (kdim, embed_dim), jnp.float32, -s_enc, s_enc)
        enc_b = jax.random.uniform(k2, (embed_dim,), jnp.float32, -s_enc, s_enc)
        head_w = jax.random.uniform(k3, (embed_dim, n_class), jnp.float32, -s_head, s_head)
        head_b = jax.random.uniform(k4, (n_class,), jnp.float32, -s_head, s_head)

        # zero-pad once at init:
        #   K -> mult of 128, embed_dim -> mult of 128, head N -> mult of 128.
        # Padded enc columns give h==GELU(0)==0 and padded head rows are zero,
        # so padding contributes nothing to the real logits / features.
        enc_w = jnp.pad(enc_w, ((0, self.kdim_pad - kdim),
                                (0, self.e_pad - embed_dim)))
        enc_b = jnp.pad(enc_b, (0, self.e_pad - embed_dim))
        head_w = jnp.pad(head_w, ((0, self.e_pad - embed_dim),
                                  (0, self.n_pad - n_class)))
        head_b = jnp.pad(head_b, (0, self.n_pad - n_class))

        # bf16 MXU operands; biases stay f32 for the f32 epilogue
        self.enc_w = enc_w.astype(jnp.bfloat16)
        self.head_w = head_w.astype(jnp.bfloat16)
        self.enc_b = enc_b.reshape(1, self.e_pad)
        self.head_b = head_b.reshape(1, self.n_pad)

        statics = dict(kdim=kdim, kdim_pad=self.kdim_pad,
                       embed_dim=embed_dim, n_class=n_class)
        # two jitted variants: return_feature baked in as a Python static
        self._fwd_logits = jax.jit(
            functools.partial(_forward, return_feature=False, **statics))
        self._fwd_feats = jax.jit(
            functools.partial(_forward, return_feature=True, **statics))

    def __call__(self, image, return_feature=False):
        if return_feature:
            return self._fwd_feats(image, self.enc_w, self.enc_b,
                                   self.head_w, self.head_b)
        return self._fwd_logits(image, self.enc_w, self.enc_b,
                                self.head_w, self.head_b)


if __name__ == "__main__":
    key = jax.random.PRNGKey(0)
    k_img, k_par = jax.random.split(key)

    B, C, H, W = 2, 4, 16, 16          # image: (2, 4, 16, 16) NCHW
    embed_dim, n_class = 32, 8

    image = jax.random.normal(k_img, (B, C, H, W), jnp.float32)
    model = CustomModelPallas(k_par, C, H, W, embed_dim, n_class)

    logits, feats = model(image, return_feature=True)
    jax.block_until_ready((logits, feats))

    # reference check in plain JAX (same bf16 operands, f32 accumulation)
    xf = image.reshape(B, -1).astype(jnp.bfloat16)
    xf = jnp.pad(xf, ((0, 0), (0, model.kdim_pad - model.kdim)))
    h_ref = jnp.dot(xf, model.enc_w, preferred_element_type=jnp.float32) + model.enc_b
    h_ref = 0.5 * h_ref * (1.0 + jnp.tanh(
        _SQRT_2_OVER_PI * (h_ref + 0.044715 * h_ref ** 3)))
    l_ref = jnp.dot(h_ref.astype(jnp.bfloat16), model.head_w,
                    preferred_element_type=jnp.float32) + model.head_b
    l_ref = l_ref[:, :n_class]
    h_ref = h_ref[:, :embed_dim]

    assert logits.shape == (B, n_class) and feats.shape == (B, embed_dim)
    assert jnp.allclose(feats, h_ref, atol=2e-2, rtol=2e-2), "feature mismatch"
    assert jnp.allclose(logits, l_ref, atol=2e-2, rtol=2e-2), "logits mismatch"

    # logits-only path (no feature output buffer) must match
    logits_only = model(image)
    jax.block_until_ready(logits_only)
    assert logits_only.shape == (B, n_class)
    assert jnp.allclose(logits_only, logits)

    print("KERNEL_OK")
</pallas_src>

<mosaic_0001>
module attributes {stable_mosaic.version = 11 : i64} {
  func.func @_fused_kernel_feats(%arg0: memref<16x1024xbf16, #tpu.memory_space<vmem>>, %arg1: memref<1024x128xbf16, #tpu.memory_space<vmem>>, %arg2: memref<1x128xf32, #tpu.memory_space<vmem>>, %arg3: memref<128x128xbf16, #tpu.memory_space<vmem>>, %arg4: memref<1x128xf32, #tpu.memory_space<vmem>>, %arg5: memref<16x128xf32, #tpu.memory_space<vmem>>, %arg6: memref<16x128xf32, #tpu.memory_space<vmem>>) attributes {dimension_semantics = [], scalar_prefetch = 0 : i64, scratch_operands = 0 : i64, tpu.core_type = #tpu.core_type<tc>} {
    %c0 = arith.constant 0 : index
    %c0_0 = arith.constant 0 : index
    %0 = vector.load %arg0[%c0, %c0_0] : memref<16x1024xbf16, #tpu.memory_space<vmem>>, vector<16x1024xbf16>
    %c0_1 = arith.constant 0 : index
    %c0_2 = arith.constant 0 : index
    %1 = vector.load %arg1[%c0_1, %c0_2] : memref<1024x128xbf16, #tpu.memory_space<vmem>>, vector<1024x128xbf16>
    %cst = arith.constant dense<0.000000e+00> : vector<16x128xf32>
    %2 = tpu.matmul %0, %1, %cst {dimension_numbers = #tpu.dot_dimension_numbers<[1], [0], [0], [1], [0, 0, 1, 1], [], []>} : vector<16x1024xbf16>, vector<1024x128xbf16>, vector<16x128xf32> -> vector<16x128xf32>
    %c0_3 = arith.constant 0 : index
    %c0_4 = arith.constant 0 : index
    %3 = vector.load %arg2[%c0_3, %c0_4] : memref<1x128xf32, #tpu.memory_space<vmem>>, vector<1x128xf32>
    %4 = vector.broadcast %3 : vector<1x128xf32> to vector<16x128xf32>
    %5 = arith.addf %2, %4 : vector<16x128xf32>
    %cst_5 = arith.constant 5.000000e-01 : f32
    %6 = vector.broadcast %cst_5 : f32 to vector<16x128xf32>
    %7 = arith.mulf %6, %5 : vector<16x128xf32>
    %cst_6 = arith.constant 4.471500e-02 : f32
    %8 = vector.broadcast %cst_6 : f32 to vector<16x128xf32>
    %9 = arith.mulf %8, %5 : vector<16x128xf32>
    %10 = arith.mulf %9, %5 : vector<16x128xf32>
    %11 = arith.mulf %10, %5 : vector<16x128xf32>
    %12 = arith.addf %5, %11 : vector<16x128xf32>
    %cst_7 = arith.constant 0.797884583 : f32
    %13 = vector.broadcast %cst_7 : f32 to vector<16x128xf32>
    %14 = arith.mulf %13, %12 : vector<16x128xf32>
    %15 = math.tanh %14 : vector<16x128xf32>
    %cst_8 = arith.constant 1.000000e+00 : f32
    %16 = vector.broadcast %cst_8 : f32 to vector<16x128xf32>
    %17 = arith.addf %16, %15 : vector<16x128xf32>
    %18 = arith.mulf %7, %17 : vector<16x128xf32>
    %19 = arith.truncf %18 : vector<16x128xf32> to vector<16x128xbf16>
    %c0_9 = arith.constant 0 : index
    %c0_10 = arith.constant 0 : index
    %20 = vector.load %arg3[%c0_9, %c0_10] : memref<128x128xbf16, #tpu.memory_space<vmem>>, vector<128x128xbf16>
    %cst_11 = arith.constant dense<0.000000e+00> : vector<16x128xf32>
    %21 = tpu.matmul %19, %20, %cst_11 {dimension_numbers = #tpu.dot_dimension_numbers<[1], [0], [0], [1], [0, 0, 1, 1], [], []>} : vector<16x128xbf16>, vector<128x128xbf16>, vector<16x128xf32> -> vector<16x128xf32>
    %c0_12 = arith.constant 0 : index
    %c0_13 = arith.constant 0 : index
    %22 = vector.load %arg4[%c0_12, %c0_13] : memref<1x128xf32, #tpu.memory_space<vmem>>, vector<1x128xf32>
    %23 = vector.broadcast %22 : vector<1x128xf32> to vector<16x128xf32>
    %24 = arith.addf %21, %23 : vector<16x128xf32>
    %c0_14 = arith.constant 0 : index
    %c0_15 = arith.constant 0 : index
    %25 = vector.load %arg6[%c0_14, %c0_15] : memref<16x128xf32, #tpu.memory_space<vmem>>, vector<16x128xf32>
    tpu.vector_store %arg6[%c0_14, %c0_15], %18 {strides = array<i32>} : memref<16x128xf32, #tpu.memory_space<vmem>>, vector<16x128xf32>,
    %c0_16 = arith.constant 0 : index
    %c0_17 = arith.constant 0 : index
    %26 = vector.load %arg5[%c0_16, %c0_17] : memref<16x128xf32, #tpu.memory_space<vmem>>, vector<16x128xf32>
    tpu.vector_store %arg5[%c0_16, %c0_17], %24 {strides = array<i32>} : memref<16x128xf32, #tpu.memory_space<vmem>>, vector<16x128xf32>,
    return
  }
}

</mosaic_0001>

<bundles_post_ra>
// kernel: _forward.1
= control target key start
LH: loop header
LB: loop body
LE: loop exit
PB: predicated region body
PF: predicated region fallthrough
CT: control target
= control target key end

     0   :  { %12 = vsyncpa [#allocation3], 0  ;;  %s1216_s21 = smov [#allocation2]   ;;  %s1334_s0 = inlined_call_operand.vmem [shape: bf16[16,1024], index: 0, kind: input, shape index: {}]   ;;  %s1335_s1 = inlined_call_operand.hbm [shape: bf16[1024,128], index: 1, kind: input, shape index: {}]   ;;  %s1336_s2 = inlined_call_operand.vmem [shape: f32[1,128], index: 2, kind: input, shape index: {}]   ;;  %s1337_s3 = inlined_call_operand.vmem [shape: bf16[128,128], index: 3, kind: input, shape index: {}]   ;;  %s1338_s4 = inlined_call_operand.vmem [shape: f32[1,128], index: 4, kind: input, shape index: {}]   ;;  %s1339_s5 = inlined_call_operand.vmem [shape: f32[16,128], index: 5, kind: output, shape index: {0}]   ;;  %s1340_s6 = inlined_call_operand.vmem [shape: f32[16,128], index: 6, kind: output, shape index: {1}]  }
   0x1   :  { %s20_s22 = sshll.u32 %s1216_s21, 4  ;;  %s1192_s25 = scalar_lea.hbm %s1335_s1, 8192  ;;  %s21_s22 = int_to_ptr.vmem [resolvable:$true] %s20_s22 }
   0x2   :  { %p1193_p0 = scmp.ne.s32.totalorder %s1335_s1, %s1192_s25  ;;  %p1196_p1 = scmp.lt.u32.totalorder %s1192_s25, %s1335_s1 }
   0x4   :  { %p1198_p2 = pnand %p1196_p1, %p1193_p0 }
   0x6   :  { %1201 = shalt.err (!%p1198_p2)
}
   0x7   :  { %s1202_s30 = scalar_lea.vmem %s21_s22, 8192  ;;  %p1207_p4 = scmp.lt.s32.totalorder %s21_s22, %s21_s22 }
   0x8   :  { %p1203_p3 = scmp.ne.s32.totalorder %s21_s22, %s1202_s30  ;;  %p1208_p5 = scmp.lt.s32.totalorder %s1202_s30, %s1202_s30 }
   0xa   :  { %p1209_p6 = por %p1208_p5, %p1207_p4 }
   0xc   :  { %p1210_p7 = pnand %p1209_p6, %p1203_p3 }
   0xe   :  { %1213 = shalt.err (!%p1210_p7)
}
   0xf   :  { %s1217_s7 = smov 64   ;;  %s1218_s8 = smov 4  }
  0x10   :  { %26 = dma.hbm_to_vmem [thread:$0]  %s1335_s1, 8192, %s21_s22, [#allocation3], %s1217_s7, %s1217_s7, %s1218_s8  }
  0x11   :  { %1214 = dma.done.wait [#allocation3], 8192  }
  0x12   :  { %1215 = vsyncadd [#allocation3], 4294959104  ;;  %v1116_v0 = vld [vmem:[#allocation2 + $0x40] sm:$0xff]   ;;  %v1120_v4 = vld [vmem:[#allocation2 + $0x48] sm:$0xff]   ;;  %vm1220_vm0 = vmmov 0  }
  0x13   :  { %v1117_v1 = vld [vmem:[#allocation2 + $0xc0] sm:$0xff]   ;;  %994 = vmatprep.subr.bf16.mxu0 %v1116_v0  ;;  %v1121_v5 = vld [vmem:[#allocation2 + $0xc8] sm:$0xff]   ;;  %v1124_v8 = vld [vmem:[#allocation2 + $0x50] sm:$0xff]  }
  0x14   :  { %v1118_v2 = vld [vmem:[#allocation2] sm:$0xff]   ;;  %1016 = vmatprep.subr.bf16.mxu1 %v1117_v1  ;;  %v1122_v6 = vld [vmem:[#allocation2 + $0x8] sm:$0xff]   ;;  %v1125_v9 = vld [vmem:[#allocation2 + $0xd0] sm:$0xff]  }
  0x15   :  { %v1119_v3 = vld [vmem:[#allocation2 + $0x80] sm:$0xff]   ;;  %995 = vmatpush3.bf16.msra.mxu0 %v1118_v2  ;;  %v1123_v7 = vld [vmem:[#allocation2 + $0x88] sm:$0xff]   ;;  %v1126_v10 = vld [vmem:[#allocation2 + $0x10] sm:$0xff]  }
  0x16   :  { %1017 = vmatpush3.bf16.msra.mxu1 %v1119_v3  ;;  %996 = vmatprep.subr.bf16.mxu0 %v1120_v4  ;;  %v1127_v11 = vld [vmem:[#allocation2 + $0x90] sm:$0xff]   ;;  %v1128_v12 = vld [vmem:[#allocation2 + $0x58] sm:$0xff]   ;;  %v1132_v16 = vld [vmem:[#allocation2 + $0x60] sm:$0xff]  }
  0x17   :  { %1018 = vmatprep.subr.bf16.mxu1 %v1121_v5  ;;  %v1129_v13 = vld [vmem:[#allocation2 + $0xd8] sm:$0xff]   ;;  %v1133_v17 = vld [vmem:[#allocation2 + $0xe0] sm:$0xff]   ;;  %v1136_v20 = vld [vmem:[#allocation2 + $0x68] sm:$0xff]  }
  0x18   :  { %v1130_v14 = vld [vmem:[#allocation2 + $0x18] sm:$0xff]   ;;  %v1134_v18 = vld [vmem:[#allocation2 + $0x20] sm:$0xff]   ;;  %v1137_v21 = vld [vmem:[#allocation2 + $0xe8] sm:$0xff]  }
  0x19   :  { %997 = vmatpush3.bf16.msra.mxu0 %v1122_v6  ;;  %v1131_v15 = vld [vmem:[#allocation2 + $0x98] sm:$0xff]   ;;  %v1135_v19 = vld [vmem:[#allocation2 + $0xa0] sm:$0xff]   ;;  %v1138_v22 = vld [vmem:[#allocation2 + $0x28] sm:$0xff]  }
  0x1a   :  { %1019 = vmatpush3.bf16.msra.mxu1 %v1123_v7  ;;  %998 = vmatprep.subr.bf16.mxu0 %v1124_v8  ;;  %v1139_v23 = vld [vmem:[#allocation2 + $0xa8] sm:$0xff]   ;;  %v1140_v24 = vld [vmem:[#allocation2 + $0x70] sm:$0xff]   ;;  %v1144_v28 = vld [vmem:[#allocation2 + $0x78] sm:$0xff]  }
  0x1b   :  { %1020 = vmatprep.subr.bf16.mxu1 %v1125_v9  ;;  %v1141_v25 = vld [vmem:[#allocation2 + $0xf0] sm:$0xff]   ;;  %v1145_v29 = vld [vmem:[#allocation2 + $0xf8] sm:$0xff]   ;;  %v37_v32 = vld [vmem:[%s1334_s0] sm:$0xff] }
  0x1c   :  { %v1142_v26 = vld [vmem:[#allocation2 + $0x30] sm:$0xff]   ;;  %v1146_v30 = vld [vmem:[#allocation2 + $0x38] sm:$0xff]   ;;  %v41_v33 = vld [vmem:[%s1334_s0 + $0x20] sm:$0xff] }
  0x1d   :  { %999 = vmatpush3.bf16.msra.mxu0 %v1126_v10  ;;  %v1143_v27 = vld [vmem:[#allocation2 + $0xb0] sm:$0xff]   ;;  %v1147_v31 = vld [vmem:[#allocation2 + $0xb8] sm:$0xff]   ;;  %v38_v34 = vld [vmem:[%s1334_s0 + $0x8] sm:$0xff]  ;;  %v913_v35 = vcombine.low %v37_v32, %v41_v33  ;;  %v914_v36 = vcombine.high %v37_v32, %v41_v33 }
  0x1e   :  { %1021 = vmatpush3.bf16.msra.mxu1 %v1127_v11  ;;  %1000 = vmatprep.subr.bf16.mxu0 %v1128_v12  ;;  %v42_v37 = vld [vmem:[%s1334_s0 + $0x28] sm:$0xff]  ;;  %v1148_v40 = vld [vmem:[#allocation2 + $0x140] sm:$0xff]   ;;  %v1156_v48 = vld [vmem:[#allocation2 + $0x150] sm:$0xff]  }
  0x1f   :  { %1022 = vmatprep.subr.bf16.mxu1 %v1129_v13  ;;  %v915_v38 = vcombine.low %v38_v34, %v42_v37  ;;  %v916_v39 = vcombine.high %v38_v34, %v42_v37  ;;  %636 = vmatprep.mubr.bf16.mxu0 %v914_v36  ;;  %v1149_v41 = vld [vmem:[#allocation2 + $0x1c0] sm:$0xff]   ;;  %v1152_v44 = vld [vmem:[#allocation2 + $0x148] sm:$0xff]   ;;  %v1157_v49 = vld [vmem:[#allocation2 + $0x1d0] sm:$0xff]  }
  0x20   :  { %v1150_v42 = vld [vmem:[#allocation2 + $0x100] sm:$0xff]   ;;  %v1153_v45 = vld [vmem:[#allocation2 + $0x1c8] sm:$0xff]   ;;  %v1158_v50 = vld [vmem:[#allocation2 + $0x110] sm:$0xff]  }
  0x21   :  { %1001 = vmatpush3.bf16.msra.mxu0 %v1130_v14  ;;  %677 = vmatprep.mubr.bf16.mxu1 %v916_v39  ;;  %v1151_v43 = vld [vmem:[#allocation2 + $0x180] sm:$0xff]   ;;  %v1154_v46 = vld [vmem:[#allocation2 + $0x108] sm:$0xff]   ;;  %v1159_v51 = vld [vmem:[#allocation2 + $0x190] sm:$0xff]  }
  0x22   :  { %1023 = vmatpush3.bf16.msra.mxu1 %v1131_v15  ;;  %1002 = vmatprep.subr.bf16.mxu0 %v1132_v16  ;;  %v1155_v47 = vld [vmem:[#allocation2 + $0x188] sm:$0xff]   ;;  %v1160_v52 = vld [vmem:[#allocation2 + $0x158] sm:$0xff]   ;;  %v1164_v56 = vld [vmem:[#allocation2 + $0x160] sm:$0xff]  }
  0x23   :  { %1024 = vmatprep.subr.bf16.mxu1 %v1133_v17  ;;  %v1161_v53 = vld [vmem:[#allocation2 + $0x1d8] sm:$0xff]   ;;  %v1165_v57 = vld [vmem:[#allocation2 + $0x1e0] sm:$0xff]   ;;  %v1168_v60 = vld [vmem:[#allocation2 + $0x168] sm:$0xff]   ;;  %v1219_v17 = vmov 0.0  }
  0x24   :  { %v1162_v54 = vld [vmem:[#allocation2 + $0x118] sm:$0xff]   ;;  %v1166_v58 = vld [vmem:[#allocation2 + $0x120] sm:$0xff]   ;;  %v1169_v61 = vld [vmem:[#allocation2 + $0x1e8] sm:$0xff]  }
  0x25   :  { %1003 = vmatpush3.bf16.msra.mxu0 %v1134_v18  ;;  %v1163_v55 = vld [vmem:[#allocation2 + $0x198] sm:$0xff]   ;;  %v1167_v59 = vld [vmem:[#allocation2 + $0x1a0] sm:$0xff]   ;;  %v1170_v62 = vld [vmem:[#allocation2 + $0x128] sm:$0xff]  }
  0x26   :  { %1025 = vmatpush3.bf16.msra.mxu1 %v1135_v19  ;;  %1004 = vmatprep.subr.bf16.mxu0 %v1136_v20  ;;  %v1171_v63 = vld [vmem:[#allocation2 + $0x1a8] sm:$0xff]   ;;  %v1172_v0 = vld [vmem:[#allocation2 + $0x170] sm:$0xff]   ;;  %v1176_v4 = vld [vmem:[#allocation2 + $0x178] sm:$0xff]  }
  0x27   :  { %1026 = vmatprep.subr.bf16.mxu1 %v1137_v21  ;;  %v1173_v1 = vld [vmem:[#allocation2 + $0x1f0] sm:$0xff]   ;;  %v1177_v5 = vld [vmem:[#allocation2 + $0x1f8] sm:$0xff]   ;;  %v1180_v16 = vld [vmem:[%s1337_s3] sm:$0xff]  }
  0x28   :  { %v1174_v2 = vld [vmem:[#allocation2 + $0x130] sm:$0xff]   ;;  %v1178_v6 = vld [vmem:[#allocation2 + $0x138] sm:$0xff]   ;;  %v1181_v18 = vld [vmem:[%s1337_s3 + $0x8] sm:$0xff]  }
  0x29   :  { %1005 = vmatpush3.bf16.msra.mxu0 %v1138_v22  ;;  %v1175_v3 = vld [vmem:[#allocation2 + $0x1b0] sm:$0xff]   ;;  %v1179_v7 = vld [vmem:[#allocation2 + $0x1b8] sm:$0xff]   ;;  %v1184_v21 = vld [vmem:[%s1337_s3 + $0x20] sm:$0xff]  }
  0x2a   :  { %1027 = vmatpush3.bf16.msra.mxu1 %v1139_v23  ;;  %1006 = vmatprep.subr.bf16.mxu0 %v1140_v24  ;;  %v39_v8 = vld [vmem:[%s1334_s0 + $0x10] sm:$0xff]  ;;  %v40_v12 = vld [vmem:[%s1334_s0 + $0x18] sm:$0xff]  ;;  %v1185_v22 = vld [vmem:[%s1337_s3 + $0x28] sm:$0xff]  }
  0x2b   :  { %1028 = vmatprep.subr.bf16.mxu1 %v1141_v25  ;;  %v43_v9 = vld [vmem:[%s1334_s0 + $0x30] sm:$0xff]  ;;  %v44_v13 = vld [vmem:[%s1334_s0 + $0x38] sm:$0xff] }
  0x2c   :  { %v917_v10 = vcombine.low %v39_v8, %v43_v9  ;;  %v918_v11 = vcombine.high %v39_v8, %v43_v9  ;;  %v919_v14 = vcombine.low %v40_v12, %v44_v13  ;;  %v920_v15 = vcombine.high %v40_v12, %v44_v13  ;;  %v1182_v19 = vld [vmem:[%s1337_s3 + $0x10] sm:$0xff]   ;;  %v1183_v20 = vld [vmem:[%s1337_s3 + $0x18] sm:$0xff]   ;;  %v985_v13 = vld [vmem:[%s1338_s4] ss:$0 sm:$0xff] }
  0x2d   :  { %1007 = vmatpush3.bf16.msra.mxu0 %v1142_v26  ;;  %v1186_v23 = vld [vmem:[%s1337_s3 + $0x30] sm:$0xff]   ;;  %v1187_v24 = vld [vmem:[%s1337_s3 + $0x38] sm:$0xff]  }
  0x2e   :  { %1029 = vmatpush3.bf16.msra.mxu1 %v1143_v27  ;;  %1008 = vmatprep.subr.bf16.mxu0 %v1144_v28  ;;  %v912_v27 = vld [vmem:[%s1336_s2] ss:$0 sm:$0xff] }
  0x2f   :  { %1030 = vmatprep.subr.bf16.mxu1 %v1145_v29 }
  0x31   :  { %1009 = vmatpush3.bf16.msra.mxu0 %v1146_v30 }
  0x32   :  { %1031 = vmatpush3.bf16.msra.mxu1 %v1147_v31  ;;  %1038 = vmatprep.subr.bf16.mxu0 %v1148_v40 }
  0x33   :  { %1060 = vmatprep.subr.bf16.mxu1 %v1149_v41 }
  0x34   :  { %637 = vmatmul.mubr.bf16.vlgmr.msra.gmra.mrb[0].mxu0 %v913_v35 }
  0x35   :  { %678 = vmatmul.mubr.bf16.vlgmr.msra.gmra.mrb[0].mxu1 %v915_v38  ;;  %1039 = vmatpush3.bf16.msra.mxu0 %v1150_v42 }
  0x36   :  { %1061 = vmatpush3.bf16.msra.mxu1 %v1151_v43  ;;  %1040 = vmatprep.subr.bf16.mxu0 %v1152_v44 }
  0x37   :  { %1062 = vmatprep.subr.bf16.mxu1 %v1153_v45  ;;  %718 = vmatprep.mubr.bf16.mxu0 %v918_v11 }
  0x38   :  { %759 = vmatprep.mubr.bf16.mxu1 %v920_v15 }
  0x39   :  { %1041 = vmatpush3.bf16.msra.mxu0 %v1154_v46 }
  0x3a   :  { %1063 = vmatpush3.bf16.msra.mxu1 %v1155_v47  ;;  %1042 = vmatprep.subr.bf16.mxu0 %v1156_v48 }
  0x3b   :  { %1064 = vmatprep.subr.bf16.mxu1 %v1157_v49 }
  0x3d   :  { %1043 = vmatpush3.bf16.msra.mxu0 %v1158_v50 }
  0x3e   :  { %1065 = vmatpush3.bf16.msra.mxu1 %v1159_v51  ;;  %1044 = vmatprep.subr.bf16.mxu0 %v1160_v52 }
  0x3f   :  { %1066 = vmatprep.subr.bf16.mxu1 %v1161_v53 }
  0x41   :  { %1045 = vmatpush3.bf16.msra.mxu0 %v1162_v54 }
  0x42   :  { %1067 = vmatpush3.bf16.msra.mxu1 %v1163_v55  ;;  %1046 = vmatprep.subr.bf16.mxu0 %v1164_v56 }
  0x43   :  { %1068 = vmatprep.subr.bf16.mxu1 %v1165_v57 }
  0x45   :  { %1047 = vmatpush3.bf16.msra.mxu0 %v1166_v58 }
  0x46   :  { %1069 = vmatpush3.bf16.msra.mxu1 %v1167_v59  ;;  %1048 = vmatprep.subr.bf16.mxu0 %v1168_v60 }
  0x47   :  { %1070 = vmatprep.subr.bf16.mxu1 %v1169_v61 }
  0x49   :  { %1049 = vmatpush3.bf16.msra.mxu0 %v1170_v62 }
  0x4a   :  { %1071 = vmatpush3.bf16.msra.mxu1 %v1171_v63  ;;  %1050 = vmatprep.subr.bf16.mxu0 %v1172_v0 }
  0x4b   :  { %1072 = vmatprep.subr.bf16.mxu1 %v1173_v1 }
  0x4d   :  { %1051 = vmatpush3.bf16.msra.mxu0 %v1174_v2 }
  0x4e   :  { %1073 = vmatpush3.bf16.msra.mxu1 %v1175_v3  ;;  %1052 = vmatprep.subr.bf16.mxu0 %v1176_v4 }
  0x4f   :  { %1074 = vmatprep.subr.bf16.mxu1 %v1177_v5 }
  0x51   :  { %1053 = vmatpush3.bf16.msra.mxu0 %v1178_v6 }
  0x52   :  { %1075 = vmatpush3.bf16.msra.mxu1 %v1179_v7  ;;  %1091 = vmatprep.subr.bf16.mxu0 %v1219_v17 }
  0x54   :  { %719 = vmatmul.mubr.bf16.vlgmr.msra.gmra.mrb[4].mxu0 %v917_v10 }
  0x55   :  { %760 = vmatmul.mubr.bf16.vlgmr.msra.gmra.mrb[4].mxu1 %v919_v14  ;;  %1092 = vmatpush3.bf16.msra.mxu0 %v1180_v16 }
  0x56   :  { %1093 = vmatprep.subr.bf16.mxu0 %v1219_v17  ;;  %1107 = vmatprep.mubr.msk.bf16.mxu0 %vm1220_vm0, %v1219_v17 }
  0x59   :  { %1094 = vmatpush3.bf16.msra.mxu0 %v1181_v18 }
  0x5a   :  { %1095 = vmatprep.subr.bf16.mxu0 %v1219_v17 }
  0x5d   :  { %1096 = vmatpush3.bf16.msra.mxu0 %v1182_v19 }
  0x5e   :  { %1097 = vmatprep.subr.bf16.mxu0 %v1219_v17 }
  0x61   :  { %1098 = vmatpush3.bf16.msra.mxu0 %v1183_v20 }
  0x62   :  { %1099 = vmatprep.subr.bf16.mxu0 %v1219_v17 }
  0x65   :  { %1100 = vmatpush3.bf16.msra.mxu0 %v1184_v21 }
  0x66   :  { %1101 = vmatprep.subr.bf16.mxu0 %v1219_v17 }
  0x69   :  { %1102 = vmatpush3.bf16.msra.mxu0 %v1185_v22 }
  0x6a   :  { %1103 = vmatprep.subr.bf16.mxu0 %v1219_v17 }
  0x6d   :  { %1104 = vmatpush3.bf16.msra.mxu0 %v1186_v23 }
  0x6e   :  { %1105 = vmatprep.subr.bf16.mxu0 %v1219_v17 }
  0x71   :  { %1106 = vmatpush3.bf16.msra.mxu0 %v1187_v24 }
 0x107   :  { %v1010_v25 = vpop.f32.mrb[0].mxu0 }
 0x108   :  { %v1032_v26 = vpop.f32.mrb[0].mxu1  ;;  %v1011_v28 = vpop.f32.mrb[1].mxu0 }
 0x109   :  { %v1012_v29 = vadd.f32 %v1011_v28, %v1010_v25  ;;  %v1033_v30 = vpop.f32.mrb[1].mxu1  ;;  %v1013_v31 = vpop.f32.mrb[2].mxu0 }
 0x10a   :  { %v1034_v32 = vadd.f32 %v1033_v30, %v1032_v26  ;;  %v1035_v33 = vpop.f32.mrb[2].mxu1  ;;  %v1014_v34 = vpop.f32.mrb[3].mxu0 }
 0x10b   :  { %v639_v35 = vadd.f32 %v1012_v29, %v912_v27  ;;  %v1015_v36 = vadd.f32 %v1014_v34, %v1013_v31  ;;  %v1036_v37 = vpop.f32.mrb[3].mxu1 }
 0x10c   :  { %v1037_v38 = vadd.f32 %v1036_v37, %v1035_v33 }
 0x10d   :  { %v680_v39 = vadd.f32 %v1034_v32, %v639_v35  ;;  %v642_v40 = vadd.f32 %v1015_v36, %v912_v27 }
 0x10f   :  { %v683_v41 = vadd.f32 %v1037_v38, %v642_v40 }
 0x127   :  { %v1054_v42 = vpop.f32.mrb[4].mxu0 }
 0x128   :  { %v1076_v43 = vpop.f32.mrb[4].mxu1  ;;  %v1055_v44 = vpop.f32.mrb[5].mxu0 }
 0x129   :  { %v1056_v45 = vadd.f32 %v1055_v44, %v1054_v42  ;;  %v1077_v46 = vpop.f32.mrb[5].mxu1  ;;  %v1057_v47 = vpop.f32.mrb[6].mxu0 }
 0x12a   :  { %v1078_v48 = vadd.f32 %v1077_v46, %v1076_v43  ;;  %v1079_v49 = vpop.f32.mrb[6].mxu1  ;;  %v1058_v50 = vpop.f32.mrb[7].mxu0 }
 0x12b   :  { %v721_v51 = vadd.f32 %v1056_v45, %v680_v39  ;;  %v1059_v52 = vadd.f32 %v1058_v50, %v1057_v47  ;;  %v1080_v53 = vpop.f32.mrb[7].mxu1 }
 0x12c   :  { %v1081_v54 = vadd.f32 %v1080_v53, %v1079_v49 }
 0x12d   :  { %v762_v55 = vadd.f32 %v1078_v48, %v721_v51  ;;  %v724_v56 = vadd.f32 %v1059_v52, %v683_v41 }
 0x12f   :  { %v770_v57 = vmul.f32 0.044715, %v762_v55  ;;  %v765_v58 = vadd.f32 %v1081_v54, %v724_v56  ;;  %v768_v5 = vmul.f32 0.5, %v762_v55 }
 0x131   :  { %v772_v59 = vmul.f32 %v770_v57, %v762_v55  ;;  %v771_v60 = vmul.f32 0.044715, %v765_v58  ;;  %v769_v8 = vmul.f32 0.5, %v765_v58 }
 0x133   :  { %v774_v61 = vmul.f32 %v772_v59, %v762_v55  ;;  %v773_v62 = vmul.f32 %v771_v60, %v765_v58 }
 0x135   :  { %v776_v63 = vadd.f32 %v774_v61, %v762_v55  ;;  %v775_v0 = vmul.f32 %v773_v62, %v765_v58 }
 0x137   :  { %v777_v1 = vadd.f32 %v775_v0, %v765_v58  ;;  %v778_v2 = vmul.f32 0.7978846, %v776_v63 }
 0x139   :  { %v779_v3 = vmul.f32 0.7978846, %v777_v1  ;;  %1188 = vtanh.f32 %v778_v2 }
 0x13b   :  { %1190 = vtanh.f32 %v779_v3 }
 0x143   :  { %v1189_v4 = vpop.eup %1188 }
 0x144   :  { %v782_v6 = vadd.f32 1.0, %v1189_v4 }
 0x145   :  { %v1191_v7 = vpop.eup %1190 }
 0x146   :  { %v783_v9 = vadd.f32 1.0, %v1191_v7  ;;  %v784_v10 = vmul.f32 %v782_v6, %v768_v5 }
 0x148   :  { %v785_v11 = vmul.f32 %v783_v9, %v769_v8  ;;  %899 = vst [vmem:[%s1340_s6] sm:$0xff] %v784_v10 }
 0x14a   :  { %v786_v12 = vpack.c.bf16 %v785_v11, %v784_v10  ;;  %900 = vst [vmem:[%s1340_s6 + $0x8] sm:$0xff] %v785_v11 }
 0x14c   :  { %1108 = vmatmul.mubr.bf16.vlgmr.msra.gmra.mrb[8].mxu0 %v786_v12 }
 0x21f   :  { %v892_v14 = vpop.f32.mrb[8].mxu0 }
 0x220   :  { %v893_v15 = vadd.f32 %v985_v13, %v892_v14  ;;  %v1109_v16 = vpop.f32.mrb[9].mxu0 }
 0x221   :  { %v895_v17 = vpop.f32.mrb[10].mxu0 }
 0x222   :  { %901 = vst [vmem:[%s1339_s5] sm:$0xff] %v893_v15  ;;  %v896_v18 = vadd.f32 %v985_v13, %v895_v17  ;;  %v1110_v19 = vpop.f32.mrb[11].mxu0 }
 0x224   :  { %902 = vst [vmem:[%s1339_s5 + $0x8] sm:$0xff] %v896_v18 }
 0x225   :  { %911 = vsyncpa [#allocation3], 1 }

</bundles_post_ra>
